<compile_context>
chip_gen: v5e
topology: v5e:2x2
jax: 0.10.0
libtpu: 0.0.40
codegen_flags: <defaults>
</compile_context>

<pallas_src>
import jax
import jax.numpy as jnp
from jax.experimental import pallas as pl
from jax.experimental.pallas import tpu as pltpu


def _affine_kernel(scale_ref, bias_ref, x_ref, o_ref):
    # scale_ref/bias_ref: (tR, 1) float32 VMEM; x_ref/o_ref: (tR, tL) VMEM.
    # Lane-broadcast fused multiply-add in f32, cast once on the way out.
    x = x_ref[...].astype(jnp.float32)
    o_ref[...] = (x * scale_ref[...] + bias_ref[...]).astype(o_ref.dtype)


def _default_block_bytes():
    """~4 MiB blocks (v6e/v7x sweet spot); ~2 MiB on v5e."""
    try:
        kind = jax.devices()[0].device_kind.lower()
    except Exception:  # pragma: no cover - defensive only
        kind = ""
    if "v5 lite" in kind or "v5e" in kind or "v5lite" in kind:
        return 2 * 1024 * 1024
    return 4 * 1024 * 1024


def _pick_tiles(R, L, itemsize, target_block_bytes):
    """Jointly pick (tR, tL): (8,128)-legal block dims close to the byte budget.

    Legality: each of the last two block dims must be a multiple of (8, 128)
    respectively OR equal the full array extent.  Perf preferences: tL a large
    multiple of 128 that evenly divides L (lane-dense, no ragged edge); tR a
    multiple of the dtype-packed sublane quantum.
    """
    sub_q = max(8, 32 // itemsize)                       # 8 f32 / 16 bf16 / 32 i8
    budget = max(128, target_block_bytes // itemsize)    # elements per block

    # ---- lane (last) dim ---------------------------------------------------
    if L <= 128:
        tL = L                                           # full extent: legal
    else:
        rows_goal = min(R, sub_q)                        # leave room for >=1 packed row group
        cap = min(max(128, budget // max(1, rows_goal)), L)
        if cap >= L and L % 128 == 0:
            tL = L                                       # whole rows, no ragged edge
        else:
            kmax = max(1, cap // 128)
            tL = kmax * 128
            # Prefer a multiple of 128 that divides L (bounded search).
            for k in range(kmax, max(0, kmax - 64), -1):
                if L % (k * 128) == 0:
                    tL = k * 128
                    break

    # ---- sublane (second-last) dim ------------------------------------------
    rows_budget = max(1, budget // max(1, tL))
    if R <= rows_budget:
        tR = R                                           # full extent: legal
    else:
        tR = max(sub_q, (rows_budget // sub_q) * sub_q)  # dtype-aware quantum
        if tR >= R:
            tR = R
    return tR, tL


def normalization_forward(img, mean, std, *, donate_input=False,
                          min_pallas_bytes=256 * 1024, target_block_bytes=None):
    """img: (N, C, H, W); mean/std: (C,). Returns (img - mean[:,None,None]) / std[...]."""
    N, C, H, W = img.shape
    itemsize = jnp.dtype(img.dtype).itemsize

    mean32 = jnp.asarray(mean, jnp.float32).reshape(-1)
    std32 = jnp.asarray(std, jnp.float32).reshape(-1)
    scale = 1.0 / std32                                  # (C,) f32; inf/nan if std==0,
    bias = -mean32 * scale                               # same as the reference division.

    # Tiny inputs: fixed pallas_call launch/pipeline overhead dominates.
    if img.size == 0 or img.size * itemsize < min_pallas_bytes:
        out = (img.astype(jnp.float32) * scale.reshape(1, C, 1, 1)
               + bias.reshape(1, C, 1, 1))
        return out.astype(img.dtype)

    # Layout: lane-dense 2-D slab + per-row f32 scale/bias columns.
    if W % 128 == 0:
        R, L = N * C * H, W                              # many sublane rows
        row_scale = jnp.repeat(jnp.tile(scale, N), H)    # row r <-> (n, c, h)
        row_bias = jnp.repeat(jnp.tile(bias, N), H)
    else:
        R, L = N * C, H * W                              # contiguous, lane-dense L
        row_scale = jnp.tile(scale, N)                   # row r <-> channel r % C
        row_bias = jnp.tile(bias, N)
    x2 = img.reshape(R, L)                               # zero-cost view
    scale_col = row_scale.reshape(R, 1)
    bias_col = row_bias.reshape(R, 1)

    if target_block_bytes is None:
        target_block_bytes = _default_block_bytes()
    tR, tL = _pick_tiles(R, L, itemsize, target_block_bytes)
    grid = (pl.cdiv(R, tR), pl.cdiv(L, tL))

    out2 = pl.pallas_call(
        _affine_kernel,
        out_shape=jax.ShapeDtypeStruct((R, L), img.dtype),
        grid=grid,
        in_specs=[
            pl.BlockSpec((tR, 1), lambda i, j: (i, 0)),    # scale column (f32)
            pl.BlockSpec((tR, 1), lambda i, j: (i, 0)),    # bias column (f32)
            pl.BlockSpec((tR, tL), lambda i, j: (i, j)),   # image tile
        ],
        out_specs=pl.BlockSpec((tR, tL), lambda i, j: (i, j)),
        compiler_params=pltpu.CompilerParams(
            # Both axes independent -> v7x shards whichever axis has many steps
            # across its 2 TensorCores; neutral on v5e/v6e.
            dimension_semantics=("parallel", "parallel"),
            vmem_limit_bytes=32 * 1024 * 1024,
        ),
        cost_estimate=pl.CostEstimate(
            flops=2 * R * L,
            transcendentals=0,
            bytes_accessed=2 * R * L * itemsize + 2 * R * 4,
        ),
        input_output_aliases=({2: 0} if donate_input else {}),
    )(scale_col, bias_col, x2)
    return out2.reshape(N, C, H, W)


if __name__ == "__main__":
    # Classic ImageNet mean/std used by the neural_style example.
    mean = jnp.array([0.485, 0.456, 0.406], dtype=jnp.float32)
    std = jnp.array([0.229, 0.224, 0.225], dtype=jnp.float32)

    key = jax.random.PRNGKey(0)
    k1, k2 = jax.random.split(key)

    # Small NCHW demo input: exercises the flat (N*C, H*W) layout path.
    img_small = jax.random.uniform(k1, (2, 3, 16, 16), dtype=jnp.float32)
    out_small = jax.block_until_ready(
        normalization_forward(img_small, mean, std, min_pallas_bytes=0))
    ref_small = (img_small - mean.reshape(-1, 1, 1)) / std.reshape(-1, 1, 1)
    assert out_small.shape == img_small.shape and out_small.dtype == img_small.dtype
    assert jnp.allclose(out_small, ref_small, atol=1e-5, rtol=1e-5), "mismatch (small)"

    # Slightly larger input: exercises the lane-dense (N*C*H, W) row layout.
    img_rows = jax.random.uniform(k2, (1, 3, 64, 128), dtype=jnp.float32)
    out_rows = jax.block_until_ready(
        normalization_forward(img_rows, mean, std, min_pallas_bytes=0))
    ref_rows = (img_rows - mean.reshape(-1, 1, 1)) / std.reshape(-1, 1, 1)
    assert out_rows.shape == img_rows.shape and out_rows.dtype == img_rows.dtype
    assert jnp.allclose(out_rows, ref_rows, atol=1e-5, rtol=1e-5), "mismatch (rows)"

    print("KERNEL_OK")
</pallas_src>

<mosaic_0001>
module attributes {stable_mosaic.version = 11 : i64} {
  func.func @_affine_kernel(%arg0: i32, %arg1: i32, %arg2: memref<6x1xf32, #tpu.memory_space<vmem>>, %arg3: memref<6x1xf32, #tpu.memory_space<vmem>>, %arg4: memref<6x256xf32, #tpu.memory_space<vmem>>, %arg5: memref<6x256xf32, #tpu.memory_space<vmem>>) attributes {dimension_semantics = [#tpu.dimension_semantics<parallel>, #tpu.dimension_semantics<parallel>], iteration_bounds = array<i64: 1, 1>, scalar_prefetch = 0 : i64, scratch_operands = 0 : i64, tpu.core_type = #tpu.core_type<tc>, window_params = [{transform_indices = @transform_0, window_bounds = array<i64: 6, 1>}, {transform_indices = @transform_1, window_bounds = array<i64: 6, 1>}, {transform_indices = @transform_2, window_bounds = array<i64: 6, 256>}, {transform_indices = @transform_3, window_bounds = array<i64: 6, 256>}]} {
    %c0 = arith.constant 0 : index
    %c0_0 = arith.constant 0 : index
    %0 = vector.load %arg4[%c0, %c0_0] : memref<6x256xf32, #tpu.memory_space<vmem>>, vector<6x256xf32>
    %c0_1 = arith.constant 0 : index
    %c0_2 = arith.constant 0 : index
    %1 = vector.load %arg2[%c0_1, %c0_2] : memref<6x1xf32, #tpu.memory_space<vmem>>, vector<6x1xf32>
    %2 = vector.broadcast %1 : vector<6x1xf32> to vector<6x256xf32>
    %3 = arith.mulf %0, %2 : vector<6x256xf32>
    %c0_3 = arith.constant 0 : index
    %c0_4 = arith.constant 0 : index
    %4 = vector.load %arg3[%c0_3, %c0_4] : memref<6x1xf32, #tpu.memory_space<vmem>>, vector<6x1xf32>
    %5 = vector.broadcast %4 : vector<6x1xf32> to vector<6x256xf32>
    %6 = arith.addf %3, %5 : vector<6x256xf32>
    %c0_5 = arith.constant 0 : index
    %c0_6 = arith.constant 0 : index
    %7 = vector.load %arg5[%c0_5, %c0_6] : memref<6x256xf32, #tpu.memory_space<vmem>>, vector<6x256xf32>
    tpu.vector_store %arg5[%c0_5, %c0_6], %6 {strides = array<i32>} : memref<6x256xf32, #tpu.memory_space<vmem>>, vector<6x256xf32>,
    return
  }
  func.func @transform_0(%arg0: i32, %arg1: i32) -> (i32, i32) {
    %c0_i32 = arith.constant 0 : i32
    %c0_i32_0 = arith.constant 0 : i32
    return %arg0, %c0_i32 : i32, i32
  }
  func.func @transform_1(%arg0: i32, %arg1: i32) -> (i32, i32) {
    %c0_i32 = arith.constant 0 : i32
    %c0_i32_0 = arith.constant 0 : i32
    return %arg0, %c0_i32 : i32, i32
  }
  func.func @transform_2(%arg0: i32, %arg1: i32) -> (i32, i32) {
    %c0_i32 = arith.constant 0 : i32
    return %arg0, %arg1 : i32, i32
  }
  func.func @transform_3(%arg0: i32, %arg1: i32) -> (i32, i32) {
    %c0_i32 = arith.constant 0 : i32
    return %arg0, %arg1 : i32, i32
  }
}

</mosaic_0001>

<bundles_post_ra>
// kernel: tpu_custom_call.1
= control target key start
LH: loop header
LB: loop body
LE: loop exit
PB: predicated region body
PF: predicated region fallthrough
CT: control target
= control target key end

     0   :  { %v80_v1 = vmov 0   ;;  %s117_s0 = inlined_call_operand.vmem [shape: f32[6,1], index: 0, kind: input, shape index: {}]   ;;  %s118_s1 = inlined_call_operand.vmem [shape: f32[6,1], index: 1, kind: input, shape index: {}]   ;;  %s119_s2 = inlined_call_operand.vmem [shape: f32[6,256], index: 2, kind: input, shape index: {}]   ;;  %s120_s3 = inlined_call_operand.hbm [shape: f32[6,256], index: 3, kind: output, shape index: {}]  }
   0x1   :  { %v17_v0 = vld [vmem:[%s117_s0] sm:$0x3f]  ;;  %53 = vset.pattern.permute.xlu0 %v80_v1 }
   0x2   :  { %8 = vsyncpa [#allocation3], 0  ;;  %20 = vperm.xlu0 %53, %v17_v0   ;;  %v25_v2 = vld [vmem:[%s118_s1] sm:$0x3f]  ;;  %v16_v5 = vld [vmem:[%s119_s2 + $0x8] sm:$0x3f] }
   0x3   :  { %v15_v4 = vld [vmem:[%s119_s2] sm:$0x3f]  ;;  %s81_s0 = smov [#allocation2]   ;;  %s42_s23 = sshll.u32 %s120_s3, 4  ;;  %s43_s23 = int_to_ptr.hbm [resolvable:$true] %s42_s23 }
   0x4   :  { %s40_s20 = sshll.u32 %s81_s0, 4  ;;  %s41_s20 = int_to_ptr.vmem [resolvable:$true] %s40_s20 }
   0xa   :  { %28 = vperm.xlu0 %53, %v25_v2  }
  0x74   :  { %v21_v3 = vpop.permute.xlu0 %20 }
  0x75   :  { %v23_v6 = vmul.f32 %v21_v3, %v15_v4  ;;  %v24_v7 = vmul.f32 %v21_v3, %v16_v5 }
  0x7c   :  { %v29_v8 = vpop.permute.xlu0 %28 }
  0x7d   :  { %v31_v9 = vadd.f32 %v29_v8, %v23_v6  ;;  %v32_v10 = vadd.f32 %v29_v8, %v24_v7 }
  0x7f   :  { %33 = vst [vmem:[#allocation2] sm:$0x3f] %v31_v9 }
  0x80   :  { %34 = vst [vmem:[#allocation2 + $0x8] sm:$0x3f] %v32_v10 }
  0x81   :  { %45 = dma.vmem_to_hbm [thread:$0]  %s41_s20, 256, %s43_s23, [#allocation3]  }
  0x82   :  { %78 = dma.done.wait [#allocation3], 256  }
  0x83   :  { %79 = vsyncadd [#allocation3], 4294967040 }
  0x84   :  { %50 = vsyncpa [#allocation3], 1 }

</bundles_post_ra>
